<compile_context>
chip_gen: v7x
topology: tpu7x:2x2x1
jax: 0.10.0
libtpu: 0.0.40
codegen_flags: <defaults>
</compile_context>

<pallas_src>
import math

import jax
import jax.numpy as jnp
from jax.experimental import pallas as pl
from jax.experimental.pallas import tpu as pltpu


def _value_net_kernel(x_ref, w1t_ref, b1_ref, w2_ref, b2_ref, o_ref):
    # x_ref  : (S, TB)    batch tile, batch on lanes
    # w1t_ref: (H, S)     fc1 weight, pre-transposed (resident)
    # b1_ref : (H, 1)     fc1 bias column (broadcasts along lanes)
    # w2_ref : (H, 1)     fc2 weight column
    # b2_ref : (1,)       fc2 bias scalar (SMEM)
    # o_ref  : (1, 1, TB) per-tile value row (lane-dense store)
    x = x_ref[...]

    # fc1 on the MXU with f32 accumulation -> lane-dense (H, TB).
    h = jnp.dot(w1t_ref[...], x, preferred_element_type=jnp.float32)
    h = jnp.maximum(h + b1_ref[...], 0.0)

    # fc2 has out_features == 1: VPU multiply + sublane reduce over H
    # (an MXU pass with N=1 would waste 127/128 of the array).
    v = jnp.sum(h * w2_ref[...], axis=0, keepdims=True) + b2_ref[0]   # (1, TB)
    o_ref[...] = v.reshape(o_ref.shape).astype(o_ref.dtype)


def _pick_tile(batch, cap=2048):
    """Lane tile: multiple of 128, large (amortizes the ~0.35us per-step
    overhead and the output writeback), and chosen so the grid has >=2 steps
    whenever batch > 128 (so v7x can shard the 'parallel' axis over both TCs)."""
    if batch <= 128:
        return 128
    half = -(-batch // 2)
    return min(cap, ((half + 127) // 128) * 128)


def prepare_params(params):
    """One-time re-layout of (w1, b1, w2, b2) into kernel-natural shapes."""
    w1, b1, w2, b2 = params
    w1t = jnp.asarray(w1, jnp.float32).T               # (H, S)
    b1c = jnp.asarray(b1, jnp.float32).reshape(-1, 1)  # (H, 1)
    w2c = jnp.asarray(w2, jnp.float32).reshape(-1, 1)  # (H, 1)
    b2s = jnp.asarray(b2, jnp.float32).reshape(1)      # (1,)  SMEM scalar
    return w1t, b1c, w2c, b2s


def value_net_forward(x, kernel_params):
    w1t, b1c, w2c, b2s = kernel_params
    B, S = x.shape
    H = w1t.shape[0]
    assert w1t.shape == (H, S)

    TB = _pick_tile(B)
    G = (B + TB - 1) // TB
    B_pad = G * TB

    # Batch onto the lane axis; zero-pad the ragged tail (discarded below).
    xt = jnp.zeros((S, B_pad), jnp.float32).at[:, :B].set(
        x.T.astype(jnp.float32))

    out = pl.pallas_call(
        _value_net_kernel,
        out_shape=jax.ShapeDtypeStruct((G, 1, TB), jnp.float32),
        grid=(G,),
        in_specs=[
            pl.BlockSpec((S, TB), lambda i: (0, i)),   # x tile (batch on lanes)
            pl.BlockSpec((H, S), lambda i: (0, 0)),    # w1^T, resident
            pl.BlockSpec((H, 1), lambda i: (0, 0)),    # b1 column, resident
            pl.BlockSpec((H, 1), lambda i: (0, 0)),    # w2 column, resident
            pl.BlockSpec(memory_space=pltpu.MemorySpace.SMEM),  # b2 scalar
        ],
        out_specs=pl.BlockSpec((1, 1, TB), lambda i: (i, 0, 0)),
        compiler_params=pltpu.CompilerParams(
            dimension_semantics=("parallel",),  # batch tiles are independent
        ),
    )(xt, w1t, b1c, w2c, b2s)

    return out.reshape(B_pad)[:B].reshape(B, 1)


def init_params(key, state_dim, hidden_dim):
    """Mimic PyTorch nn.Linear default init: U(-1/sqrt(fan_in), 1/sqrt(fan_in))."""
    k1, k2, k3, k4 = jax.random.split(key, 4)
    bound1 = 1.0 / math.sqrt(state_dim)
    bound2 = 1.0 / math.sqrt(hidden_dim)
    w1 = jax.random.uniform(k1, (state_dim, hidden_dim), jnp.float32, -bound1, bound1)
    b1 = jax.random.uniform(k2, (hidden_dim,), jnp.float32, -bound1, bound1)
    w2 = jax.random.uniform(k3, (hidden_dim,), jnp.float32, -bound2, bound2)
    b2 = jax.random.uniform(k4, (), jnp.float32, -bound2, bound2)
    return (w1, b1, w2, b2)


def reference_forward(x, params):
    w1, b1, w2, b2 = params
    h1 = jax.nn.relu(x @ w1 + b1)
    return h1 @ w2.reshape(-1, 1) + b2


if __name__ == "__main__":
    state_dim, hidden_dim = 16, 32

    key = jax.random.PRNGKey(0)
    k_params, k_x1, k_x2 = jax.random.split(key, 3)
    params = init_params(k_params, state_dim, hidden_dim)
    kparams = prepare_params(params)

    # batch=256 -> two 128-lane tiles (multi-step grid, v7x can split it);
    # batch=200 -> ragged tail (zero-padded to 256, padding discarded).
    for bkey, batch in ((k_x1, 256), (k_x2, 200)):
        x = jax.random.normal(bkey, (batch, state_dim), dtype=jnp.float32)
        out = jax.block_until_ready(value_net_forward(x, kparams))
        ref = reference_forward(x, params)
        assert out.shape == (batch, 1)
        assert jnp.allclose(out, ref, atol=2e-3, rtol=1e-3), float(
            jnp.max(jnp.abs(out - ref)))

    print("KERNEL_OK")
</pallas_src>

<mosaic_0001>
module attributes {stable_mosaic.version = 11 : i64} {
  func.func @_value_net_kernel(%arg0: i32, %arg1: memref<16x128xf32, #tpu.memory_space<vmem>>, %arg2: memref<32x16xf32, #tpu.memory_space<vmem>>, %arg3: memref<32x1xf32, #tpu.memory_space<vmem>>, %arg4: memref<32x1xf32, #tpu.memory_space<vmem>>, %arg5: memref<1xf32, #tpu.memory_space<smem>>, %arg6: memref<1x1x128xf32, #tpu.memory_space<vmem>>) attributes {dimension_semantics = [#tpu.dimension_semantics<parallel>], iteration_bounds = array<i64: 2>, scalar_prefetch = 0 : i64, scratch_operands = 0 : i64, tpu.core_type = #tpu.core_type<tc>, window_params = [{transform_indices = @transform_0, window_bounds = array<i64: 16, 128>}, {pipeline_mode = #tpu.pipeline_mode<synchronous>, transform_indices = @transform_1, window_bounds = array<i64: 32, 16>}, {pipeline_mode = #tpu.pipeline_mode<synchronous>, transform_indices = @transform_2, window_bounds = array<i64: 32, 1>}, {pipeline_mode = #tpu.pipeline_mode<synchronous>, transform_indices = @transform_3, window_bounds = array<i64: 32, 1>}, {transform_indices = @transform_4, window_bounds = array<i64: 1>}, {transform_indices = @transform_5, window_bounds = array<i64: 1, 1, 128>}]} {
    %c0 = arith.constant 0 : index
    %c0_0 = arith.constant 0 : index
    %0 = vector.load %arg1[%c0, %c0_0] : memref<16x128xf32, #tpu.memory_space<vmem>>, vector<16x128xf32>
    %c0_1 = arith.constant 0 : index
    %c0_2 = arith.constant 0 : index
    %1 = vector.load %arg2[%c0_1, %c0_2] : memref<32x16xf32, #tpu.memory_space<vmem>>, vector<32x16xf32>
    %cst = arith.constant dense<0.000000e+00> : vector<32x128xf32>
    %2 = tpu.matmul %1, %0, %cst {dimension_numbers = #tpu.dot_dimension_numbers<[1], [0], [0], [1], [0, 0, 1, 1], [], []>} : vector<32x16xf32>, vector<16x128xf32>, vector<32x128xf32> -> vector<32x128xf32>
    %c0_3 = arith.constant 0 : index
    %c0_4 = arith.constant 0 : index
    %3 = vector.load %arg3[%c0_3, %c0_4] : memref<32x1xf32, #tpu.memory_space<vmem>>, vector<32x1xf32>
    %4 = vector.broadcast %3 : vector<32x1xf32> to vector<32x128xf32>
    %5 = arith.addf %2, %4 : vector<32x128xf32>
    %cst_5 = arith.constant 0.000000e+00 : f32
    %6 = vector.broadcast %cst_5 : f32 to vector<32x128xf32>
    %7 = arith.maximumf %5, %6 : vector<32x128xf32>
    %c0_6 = arith.constant 0 : index
    %c0_7 = arith.constant 0 : index
    %8 = vector.load %arg4[%c0_6, %c0_7] : memref<32x1xf32, #tpu.memory_space<vmem>>, vector<32x1xf32>
    %9 = vector.broadcast %8 : vector<32x1xf32> to vector<32x128xf32>
    %10 = arith.mulf %7, %9 : vector<32x128xf32>
    %cst_8 = arith.constant dense<0.000000e+00> : vector<128xf32>
    %11 = vector.multi_reduction <add>, %10, %cst_8 [0] : vector<32x128xf32> to vector<128xf32>
    %12 = vector.shape_cast %11 : vector<128xf32> to vector<1x128xf32>
    %c0_9 = arith.constant 0 : index
    %13 = memref.load %arg5[%c0_9] : memref<1xf32, #tpu.memory_space<smem>>
    %14 = vector.broadcast %13 : f32 to vector<1x128xf32>
    %15 = arith.addf %12, %14 : vector<1x128xf32>
    %16 = vector.shape_cast %15 : vector<1x128xf32> to vector<1x1x128xf32>
    %c0_10 = arith.constant 0 : index
    %c0_11 = arith.constant 0 : index
    %c0_12 = arith.constant 0 : index
    %17 = vector.load %arg6[%c0_10, %c0_11, %c0_12] : memref<1x1x128xf32, #tpu.memory_space<vmem>>, vector<1x1x128xf32>
    tpu.vector_store %arg6[%c0_10, %c0_11, %c0_12], %16 {strides = array<i32>} : memref<1x1x128xf32, #tpu.memory_space<vmem>>, vector<1x1x128xf32>,
    return
  }
  func.func @transform_0(%arg0: i32) -> (i32, i32) {
    %c0_i32 = arith.constant 0 : i32
    %c0_i32_0 = arith.constant 0 : i32
    return %c0_i32, %arg0 : i32, i32
  }
  func.func @transform_1(%arg0: i32) -> (i32, i32) {
    %c0_i32 = arith.constant 0 : i32
    %c0_i32_0 = arith.constant 0 : i32
    %c0_i32_1 = arith.constant 0 : i32
    return %c0_i32, %c0_i32_0 : i32, i32
  }
  func.func @transform_2(%arg0: i32) -> (i32, i32) {
    %c0_i32 = arith.constant 0 : i32
    %c0_i32_0 = arith.constant 0 : i32
    %c0_i32_1 = arith.constant 0 : i32
    return %c0_i32, %c0_i32_0 : i32, i32
  }
  func.func @transform_3(%arg0: i32) -> (i32, i32) {
    %c0_i32 = arith.constant 0 : i32
    %c0_i32_0 = arith.constant 0 : i32
    %c0_i32_1 = arith.constant 0 : i32
    return %c0_i32, %c0_i32_0 : i32, i32
  }
  func.func @transform_4(%arg0: i32) -> i32 {
    %c0_i32 = arith.constant 0 : i32
    %c0_i32_0 = arith.constant 0 : i32
    return %c0_i32 : i32
  }
  func.func @transform_5(%arg0: i32) -> (i32, i32, i32) {
    %c0_i32 = arith.constant 0 : i32
    %c0_i32_0 = arith.constant 0 : i32
    %c0_i32_1 = arith.constant 0 : i32
    return %arg0, %c0_i32, %c0_i32_0 : i32, i32, i32
  }
}

</mosaic_0001>

<bundles_post_ra>
// kernel: tpu_custom_call.1
= control target key start
LH: loop header
LB: loop body
LE: loop exit
PB: predicated region body
PF: predicated region fallthrough
CT: control target
= control target key end

     0   :  { %s835_s0 = inlined_call_operand.vmem [shape: f32[16,256], index: 0, kind: input, shape index: {}]   ;;  %s836_s1 = inlined_call_operand.vmem [shape: f32[32,16], index: 1, kind: input, shape index: {}]   ;;  %s837_s2 = inlined_call_operand.vmem [shape: f32[32,1], index: 2, kind: input, shape index: {}]   ;;  %s838_s3 = inlined_call_operand.vmem [shape: f32[32,1], index: 3, kind: input, shape index: {}]   ;;  %s839_s4 = inlined_call_operand.<no memory space> [shape: f32[1], index: 4, kind: input, shape index: {}]   ;;  %s840_s5 = inlined_call_operand.hbm [shape: f32[2,1,128], index: 5, kind: output, shape index: {}]  }
   0x1   :  { %10 = sst [smem:[#allocation2]] %s839_s4 }
   0x2   :  { %11 = vsyncpa [#allocation5], 0 }
   0x3   :  { %13 = vsyncpa [#allocation5 + $0x1], 0  ;;  %s685_s20 = smov 0   ;;  %s687_s21 = smov 0  }
   0x4   :  { %s689_s22 = smov 0   ;;  %s691_s23 = smov 0  }
   0x5 LB: > { %s507_s4 = sadd.s32 4294967295, %s648_s23   ;;  %s508_s24 = sadd.s32 4294967294, %s648_s23   ;;  %s648_s23 = sphi %s691_s23, %s846_s23   ;;  %s644_s22 = sphi %s689_s22, %s845_s22   ;;  %s640_s21 = sphi %s687_s21, %s844_s21   ;;  %s636_s20 = sphi %s685_s20, %s843_s20  }
   0x6   : > { %s708_s25 = sadd.s32 1, %s648_s23   ;;  %s26_s26 = sadd.s32 1, %s644_s22 }
   0x7   : > { %s23_s27 = ssub.s32 %s648_s23, %s708_s25  ;;  %p33_p0 = scmp.ne.s32.totalorder %s644_s22, %s640_s21 }
   0x8   : > { %p24_p1 = scmp.eq.s32.totalorder %s23_s27, 0  ;;  %p34_p2 = scmp.eq.s32.totalorder %s648_s23, 0 }
   0x9   : > { %p147_p3 = scmp.eq.s32.totalorder %s507_s4, 1  ;;  %p152_p4 = scmp.ne.s32.totalorder %s640_s21, %s636_s20 }
   0xa   : > { %s721_s28 = scalar_select %p24_p1, %s644_s22, %s26_s26  }
   0xb   : > { %p35_p5 = por %p34_p2, %p33_p0  ;;  %p723_p6 = por %p147_p3, %p33_p0 }
   0xc   : > { %p153_p7 = scmp.eq.s32.totalorder %s508_s24, 1  ;;  %p510_p9 = scmp.ge.s32.totalorder %s648_s23, 2 }
   0xe   : > { %p727_p8 = por %p153_p7, %p152_p4  ;;  %181 = sbr.rel (%p510_p9) target bundleno = 28 (0x1c), region = 32 }
  0x15   : > { %184 = sbr.rel (!%p35_p5) target bundleno = 28 (0x1c), region = 36  ;;  %s186_s6 = sand.u32 (%p35_p5), 1, %s644_s22  }
  0x16   : > { %s512_s7 = sshll.u32 (%p35_p5), %s648_s23, 3  ;;  %s511_s8 = sshll.u32 (%p35_p5), %s186_s6, 4 }
  0x17   : > { %s190_s11 = scalar_lea.vmem (%p35_p5), %s835_s0, %s512_s7  ;;  %s188_s12 = scalar_lea.vmem (%p35_p5), [#allocation3], %s511_s8 }
  0x18   : > { %v220_v0 = vld [vmem:[%s190_s11] sm:$0xff] (%p35_p5)  ;;  %v222_v1 = vld [vmem:[%s190_s11 + $0x10] sm:$0xff] (%p35_p5) }
  0x19   : > { %221 = vst [vmem:[%s188_s12] sm:$0xff] (%p35_p5), %v220_v0  ;;  %223 = vst [vmem:[%s188_s12 + $0x8] sm:$0xff] (%p35_p5), %v222_v1 }
  0x1c PF: > { %p513_p10 = scmp.ge.s32.totalorder %s648_s23, 1  ;;  %p228_p11 = scmp.lt.s32.totalorder %s648_s23, 3 }
  0x1e   : > { %p229_p12 = pnand %p513_p10, %p228_p11 }
  0x1f   : > { %s742_s13 = sand.u32 (!%p229_p12), 1, %s640_s21   ;;  %v263_v2 = vld [vmem:[%s836_s1] sm:$0xff] (!%p229_p12)  ;;  %vm291_vm0 = vcmask (!%p229_p12), 130048   ;;  %v265_v3 = vld [vmem:[%s836_s1 + $0x10] sm:$0xff] (!%p229_p12)  ;;  %v650_v6 = vmov (!%p229_p12), 0   ;;  %v268_v10 = vld [vmem:[%s837_s2 + $0x8] sm:$0xff] (!%p229_p12) }
  0x20   : > { %232 = sbr.rel (%p229_p12) target bundleno = 294 (0x126), region = 74  ;;  %s514_s18 = sshll.u32 (!%p229_p12), %s742_s13, 4  ;;  %532 = vmatprep.mubr.msk.f32.mxu0 (!%p229_p12), %vm291_vm0, %v263_v2  ;;  %535 = vmatprep.mubr.msk.f32.mxu1 (!%p229_p12), %vm291_vm0, %v265_v3  ;;  %v267_v4 = vld [vmem:[%s837_s2] sm:$0xff] (!%p229_p12)  ;;  %v269_v5 = vld [vmem:[%s837_s2 + $0x10] sm:$0xff] (!%p229_p12)  ;;  %v270_v11 = vld [vmem:[%s837_s2 + $0x18] sm:$0xff] (!%p229_p12) }
  0x21   : > { %584 = vset.pattern.permute.xlu0 (!%p229_p12), %v650_v6  ;;  %585 = vset.pattern.permute.xlu1 (!%p229_p12), %v650_v6  ;;  %s237_s6 = scalar_lea.vmem (!%p229_p12), [#allocation3], %s514_s18  ;;  %v264_v12 = vld [vmem:[%s836_s1 + $0x8] sm:$0xff] (!%p229_p12)  ;;  %v266_v13 = vld [vmem:[%s836_s1 + $0x18] sm:$0xff] (!%p229_p12)  ;;  %v393_v14 = vld [vmem:[%s838_s3] sm:$0xff] (!%p229_p12)  ;;  %s430_s7 = sld [smem:[#allocation2]] (!%p229_p12) }
  0x22   : > { %v261_v7 = vld [vmem:[%s237_s6] sm:$0xff] (!%p229_p12)  ;;  %v262_v8 = vld [vmem:[%s237_s6 + $0x8] sm:$0xff] (!%p229_p12)  ;;  %273 = vperm.xlu0 (!%p229_p12), %584, %v267_v4   ;;  %283 = vperm.xlu1 (!%p229_p12), %585, %v269_v5   ;;  %s519_s8 = sshll.u32 (!%p229_p12), %s507_s4, 4  ;;  %s260_s9 = scalar_lea.vmem (!%p229_p12), [#allocation4], %s742_s13 }
  0x23   : > { %v538_v9 = vpack.c.bf16 (!%p229_p12), %v262_v8, %v261_v7  ;;  %v394_v15 = vld [vmem:[%s838_s3 + $0x8] sm:$0xff] (!%p229_p12)  ;;  %v395_v16 = vld [vmem:[%s838_s3 + $0x10] sm:$0xff] (!%p229_p12)  ;;  %v396_v17 = vld [vmem:[%s838_s3 + $0x18] sm:$0xff] (!%p229_p12)  ;;  %s447_s10 = sshll.u32 (!%p229_p12), %s260_s9, 4  ;;  %s791_s14 = scalar_lea.hbm (!%p229_p12), %s840_s5, %s519_s8  ;;  %s793_s10 = int_to_ptr.vmem [resolvable:$true] %s447_s10 }
  0x24   : > { %s435_s15 = scalar_lea.sflag (!%p229_p12), [#allocation5], %s742_s13  ;;  %s586_s16 = scalar_lea.vmem (!%p229_p12), %s793_s10, 16 }
  0x25   : > { %539 = vmatprep.subr.bf16.mxu0 (!%p229_p12), %v538_v9  ;;  %542 = vmatprep.subr.bf16.mxu1 (!%p229_p12), %v538_v9  ;;  %p587_p13 = scmp.ne.s32.totalorder (!%p229_p12), %s793_s10, %s586_s16  ;;  %s651_s4 = smov (!%p229_p12), [#allocation4]  }
  0x26   : > { %541 = vmatpush3.bf16.msra.mxu0 (!%p229_p12), %v538_v9  ;;  %543 = vmatpush3.bf16.msra.mxu1 (!%p229_p12), %v538_v9  ;;  %s590_s17 = sshll.u32 (!%p229_p12), %s651_s4, 4  ;;  %s591_s17 = int_to_ptr.vmem [resolvable:$false] %s590_s17 }
  0x27   : > { %278 = vperm.xlu0 %584, %v268_v10   ;;  %288 = vperm.xlu1 %585, %v270_v11   ;;  %v431_v50 = vstv %s430_s7  ;;  %p588_p0 = pnand %p587_p13, %p723_p6  ;;  %s592_s18 = scalar_lea.vmem %s591_s17, 32 }
  0x28   : > { %p593_p2 = scmp.lt.s32.totalorder %s793_s10, %s591_s17  ;;  %p594_p3 = scmp.lt.s32.totalorder %s592_s18, %s586_s16 }
  0x29   : > { %533 = vmatmul.mubr.msk.f32.vlgmr.msra.gmra.mrb[0].mxu0 %vm291_vm0, %v264_v12  ;;  %536 = vmatmul.mubr.msk.f32.vlgmr.msra.gmra.mrb[0].mxu1 %vm291_vm0, %v266_v13  ;;  %p589_p1 = pneg %p588_p0 }
  0x2a   : > { %p595_p4 = por %p594_p3, %p593_p2 }
  0x2b   : > { %399 = vperm.xlu0 %584, %v393_v14   ;;  %404 = vperm.xlu1 %585, %v394_v15  }
  0x2c   : > { %p596_p5 = pnand %p595_p4, %p589_p1 }
  0x2f   : > { %409 = vperm.xlu0 %584, %v395_v16   ;;  %414 = vperm.xlu1 %585, %v396_v17  }
  0xa1   : > { %v274_v18 = vpop.permute.xlu0 %273  ;;  %v284_v19 = vpop.permute.xlu1 %283 }
  0xa6   : > { %v279_v20 = vpop.permute.xlu0 %278  ;;  %v289_v21 = vpop.permute.xlu1 %288 }
  0xaa   : > { %v400_v22 = vpop.permute.xlu0 %399  ;;  %v405_v31 = vpop.permute.xlu1 %404 }
  0xae   : > { %v410_v38 = vpop.permute.xlu0 %409  ;;  %v415_v41 = vpop.permute.xlu1 %414 }
  0xfc   : > { %v534_v23 = vpop.f32.mrb[0].mxu0  ;;  %v537_v24 = vpop.f32.mrb[0].mxu1 }
  0xfd   : > { %v376_v25 = vadd.f32 %v534_v23, %v279_v20  ;;  %v370_v26 = vpop.f32.mrb[1].mxu0  ;;  %v380_v27 = vpop.f32.mrb[1].mxu1  ;;  %v386_v28 = vadd.f32 %v537_v24, %v289_v21 }
  0xfe   : > { %v371_v29 = vadd.f32 %v370_v26, %v274_v18  ;;  %v381_v30 = vadd.f32 %v380_v27, %v284_v19 }
  0xff   : > { %v390_v32 = vmax.f32 %v376_v25, 0.0  ;;  %v392_v36 = vmax.f32 %v386_v28, 0.0 }
 0x100   : > { %v389_v33 = vmax.f32 %v371_v29, 0.0  ;;  %v391_v34 = vmax.f32 %v381_v30, 0.0 }
 0x101   : > { %v418_v35 = vmul.f32 %v405_v31, %v390_v32  ;;  %v420_v42 = vmul.f32 %v415_v41, %v392_v36 }
 0x102   : > { %v417_v37 = vmul.f32 %v400_v22, %v389_v33  ;;  %v419_v40 = vmul.f32 %v410_v38, %v391_v34 }
 0x104   : > { %v421_v39 = vadd.f32 %v418_v35, %v417_v37 }
 0x106   : > { %v422_v43 = vadd.f32 %v421_v39, %v419_v40 }
 0x108   : > { %v423_v44 = vadd.f32 %v422_v43, %v420_v42 }
 0x10a   : > { %v424_v45 = vrot.slane %v423_v44, 4 }
 0x10c   : > { %v425_v46 = vadd.f32 %v424_v45, %v423_v44 }
 0x10e   : > { %v426_v47 = vrot.slane %v425_v46, 2 }
 0x110   : > { %v427_v48 = vadd.f32 %v426_v47, %v425_v46 }
 0x112   : > { %v428_v49 = vrot.slane %v427_v48, 1 }
 0x114   : > { %v429_v51 = vadd.f32 %v428_v49, %v427_v48 }
 0x116   : > { %v432_v52 = vadd.f32 %v431_v50, %v429_v51 }
 0x118   : > { %433 = vst [vmem:[%s260_s9] sm:$0x1] %v432_v52 }
 0x119   : > { %599 = shalt.err (!%p596_p5)
}
 0x11a   : > { %s600_s13 = scalar_lea.hbm %s791_s14, 16  ;;  %s604_s26 = scalar_lea.hbm %s840_s5, 32 }
 0x11b   : > { %p601_p7 = scmp.ne.s32.totalorder %s791_s14, %s600_s13  ;;  %p605_p12 = scmp.lt.u32.totalorder %s791_s14, %s840_s5 }
 0x11c   : > { %p606_p13 = scmp.lt.u32.totalorder %s604_s26, %s600_s13  ;;  %p608_p1 = scmp.lt.u32.totalorder %s600_s13, %s791_s14 }
 0x11d   : > { %p602_p10 = pnand %p601_p7, %p723_p6 }
 0x11e   : > { %p607_p0 = por %p606_p13, %p605_p12 }
 0x11f   : > { %p603_p11 = pneg %p602_p10 }
 0x120   : > { %p609_p2 = por %p608_p1, %p607_p0 }
 0x122   : > { %p610_p3 = pnand %p609_p2, %p603_p11 }
 0x124   : > { %613 = shalt.err (!%p610_p3)
}
 0x125   : > { %544 = dma.vmem_to_hbm [thread:$0]  (%p723_p6), %s793_s10, 16, %s791_s14, %s435_s15  }
 0x126 PF: > { %s459_s7 = sand.u32 1, %s636_s20   ;;  %p547_p4 = pnand %p510_p9, %p727_p8 }
 0x127   : > { %s460_s8 = scalar_lea.sflag [#allocation5], %s459_s7 }
 0x128   : > { %631 = dma.done.wait (!%p547_p4), %s460_s8, 16  }
 0x129   : > { %633 = vsyncadd (!%p547_p4), %s460_s8, 4294967280  ;;  %p16_p5 = scmp.ge.s32.totalorder %s708_s25, 4   ;;  %s843_s20 = smov %s640_s21 }
 0x12a   : > { %s844_s21 = smov %s644_s22  ;;  %s845_s22 = smov %s721_s28 }
 0x12b   : > { %s846_s23 = smov %s708_s25  ;;  %18 = sbr.rel (!%p16_p5) target bundleno = 5 (0x5), region = 118 }
 0x132   :  { %464 = vsyncpa [#allocation5], 1 }
 0x133   :  { %466 = vsyncpa [#allocation5 + $0x1], 1 }

</bundles_post_ra>
